<compile_context>
chip_gen: v7x
topology: tpu7x:2x2x1
jax: 0.10.0
libtpu: 0.0.40
codegen_flags: <defaults>
</compile_context>

<pallas_src>
import jax
import jax.numpy as jnp
from jax import lax
from jax.experimental import pallas as pl
from jax.experimental.pallas import tpu as pltpu

_HIGH = lax.Precision.HIGHEST

# ---- module_attribute (complexity=0) static shapes ----
N, CIN, H, W = 4, 16, 7, 7          # module input_shape = [4, 16, 7, 7]
K1 = 128                            # conv_input output channels
OUT_C = 8                           # conv_output output channels
KH = KW = 3                         # both convs are 3x3
EFF = KH + KW - 1                   # effective folded kernel size = 5
OH = OW = (H + 2 * 1) - EFF + 1     # conv1 pad=1 -> 9x9, valid 5x5 -> 5
HW_OUT = OH * OW                    # 25 output positions per sample
FLAT_IN = CIN * EFF * EFF           # 400 = im2col contraction length
K_AUG = FLAT_IN + HW_OUT            # 425 (bias folded in via one-hot rows)


def _fused_conv_gemm_kernel(w_ref, x_ref, out_ref):
    # w_ref: (8, 425)   x_ref: (425, 100)   out_ref: (8, 100)
    # Single MXU GEMM; bias is already folded into the last 25 K-rows, so this
    # is one dot + one lane-dense full-block store.
    out_ref[...] = jnp.dot(w_ref[...], x_ref[...],
                           preferred_element_type=jnp.float32,
                           precision=_HIGH).astype(out_ref.dtype)


@jax.jit
def module_attribute_forward(x, w1, b1, offset, w2, b2):
    # NOTE: if the parameters are static across calls, close over them (or
    # functools.partial) so XLA constant-folds the parameter fold below.
    f32 = jnp.float32
    x, w1, b1, offset, w2, b2 = (a.astype(f32) for a in (x, w1, b1, offset, w2, b2))
    dn = ('NCHW', 'OIHW', 'NCHW')

    # ---- fold parameters (weights / biases / offset only; no input involved) ----
    # W_eff[o,c,r,s] = sum_{k,p,q} w2[o,k,p,q] * w1[k,c,r-p,s-q]
    # computed as one "full" correlation of w1 (c as batch) with spatially
    # flipped w2.
    w1_t = jnp.transpose(w1, (1, 0, 2, 3))              # (CIN, K1, 3, 3)
    w2_flip = w2[:, :, ::-1, ::-1]                      # (OUT_C, K1, 3, 3)
    w_eff = lax.conv_general_dilated(
        w1_t, w2_flip, (1, 1), ((KH - 1, KH - 1), (KW - 1, KW - 1)),
        dimension_numbers=dn, precision=_HIGH)          # (CIN, OUT_C, 5, 5)
    w_eff = jnp.transpose(w_eff, (1, 0, 2, 3))          # (OUT_C, CIN, 5, 5)

    # B_eff[o,u,v] = b2[o] + sum_k w2[o,k,:,:].sum()*b1[k]
    #             + sum_{k,p,q} w2[o,k,p,q]*offset[k,u+p,v+q]   (valid corr.)
    b_off = lax.conv_general_dilated(
        offset[None], w2, (1, 1), 'VALID',
        dimension_numbers=dn, precision=_HIGH)[0]       # (OUT_C, 5, 5)
    b_eff = (b2[:, None, None]
             + jnp.einsum('okpq,k->o', w2, b1, precision=_HIGH)[:, None, None]
             + b_off)                                   # (OUT_C, 5, 5)

    # GEMM LHS with bias appended on the contraction axis: (8, 425)
    w_aug = jnp.concatenate([w_eff.reshape(OUT_C, FLAT_IN),
                             b_eff.reshape(OUT_C, HW_OUT)], axis=1)

    # ---- im2col via a single patch-extraction op (layout only) ----
    # output channel index = c*25 + (r*5 + s), matching w_eff.reshape order.
    patches = lax.conv_general_dilated_patches(
        x, filter_shape=(EFF, EFF), window_strides=(1, 1),
        padding=((1, 1), (1, 1)), dimension_numbers=dn,
        precision=_HIGH)                                # (N, 400, 5, 5)
    # columns ordered n*25 + u*5 + v
    x_cols_t = patches.transpose(1, 0, 2, 3).reshape(FLAT_IN, N * HW_OUT)  # (400,100)
    # one-hot rows selecting b_eff[:, u*5+v] for column n*25 + u*5 + v
    onehot = jnp.tile(jnp.eye(HW_OUT, dtype=f32), (1, N))                  # (25, 100)
    x_aug = jnp.concatenate([x_cols_t, onehot], axis=0)                    # (425, 100)

    vmem = pl.BlockSpec(memory_space=pltpu.MemorySpace.VMEM)
    out_flat = pl.pallas_call(
        _fused_conv_gemm_kernel,
        out_shape=jax.ShapeDtypeStruct((OUT_C, N * HW_OUT), f32),
        in_specs=[vmem, vmem],
        out_specs=vmem,
        cost_estimate=pl.CostEstimate(
            flops=2 * OUT_C * K_AUG * N * HW_OUT,
            transcendentals=0,
            bytes_accessed=4 * (OUT_C * K_AUG + K_AUG * N * HW_OUT
                                + OUT_C * N * HW_OUT)),
    )(w_aug, x_aug)

    # (8, 100) -> NCHW (4, 8, 5, 5)
    return out_flat.reshape(OUT_C, N, OH, OW).transpose(1, 0, 2, 3)


def _reference(x, w1, b1, offset, w2, b2):
    # Independent pure-JAX reference of the unfolded module forward.
    dn = ('NCHW', 'OIHW', 'NCHW')
    y = lax.conv_general_dilated(x, w1, (1, 1), ((1, 1), (1, 1)),
                                 dimension_numbers=dn, precision=_HIGH)
    y = y + b1[None, :, None, None] + offset[None]
    out = lax.conv_general_dilated(y, w2, (1, 1), 'VALID',
                                   dimension_numbers=dn, precision=_HIGH)
    return out + b2[None, :, None, None]


if __name__ == "__main__":
    key = jax.random.PRNGKey(0)
    kx, k1, k2, k3, k4, k5 = jax.random.split(key, 6)
    x = jax.random.normal(kx, (N, CIN, H, W), dtype=jnp.float32)

    # PyTorch-style deterministic parameter init.
    bound1 = 1.0 / (CIN * KH * KW) ** 0.5
    w1 = jax.random.uniform(k1, (K1, CIN, KH, KW), jnp.float32, -bound1, bound1)
    b1 = jax.random.uniform(k2, (K1,), jnp.float32, -bound1, bound1)
    offset = 2.0 * jax.random.normal(k3, (K1, H, W), dtype=jnp.float32)  # normal(0, std=2)
    bound2 = 1.0 / (K1 * KH * KW) ** 0.5
    w2 = jax.random.uniform(k4, (OUT_C, K1, KH, KW), jnp.float32, -bound2, bound2)
    b2 = jax.random.uniform(k5, (OUT_C,), jnp.float32, -bound2, bound2)

    out = module_attribute_forward(x, w1, b1, offset, w2, b2)
    out = jax.block_until_ready(out)

    ref = _reference(x, w1, b1, offset, w2, b2)
    assert out.shape == (N, OUT_C, OH, OW)
    # Real fold/index bugs produce O(1) errors; tolerance covers fp reassociation.
    if not jnp.allclose(out, ref, atol=1e-3, rtol=1e-3):
        max_err = float(jnp.max(jnp.abs(out - ref)))
        raise AssertionError(f"Pallas kernel output mismatch vs reference (max|err|={max_err})")
    print("KERNEL_OK")
</pallas_src>

<mosaic_0001>
module attributes {stable_mosaic.version = 11 : i64} {
  func.func @_fused_conv_gemm_kernel(%arg0: memref<8x425xf32, #tpu.memory_space<vmem>>, %arg1: memref<425x100xf32, #tpu.memory_space<vmem>>, %arg2: memref<8x100xf32, #tpu.memory_space<vmem>>) attributes {dimension_semantics = [], scalar_prefetch = 0 : i64, scratch_operands = 0 : i64, tpu.core_type = #tpu.core_type<tc>} {
    %c0 = arith.constant 0 : index
    %c0_0 = arith.constant 0 : index
    %0 = vector.load %arg0[%c0, %c0_0] : memref<8x425xf32, #tpu.memory_space<vmem>>, vector<8x425xf32>
    %c0_1 = arith.constant 0 : index
    %c0_2 = arith.constant 0 : index
    %1 = vector.load %arg1[%c0_1, %c0_2] : memref<425x100xf32, #tpu.memory_space<vmem>>, vector<425x100xf32>
    %cst = arith.constant dense<0.000000e+00> : vector<8x100xf32>
    %2 = tpu.matmul %0, %1, %cst {dimension_numbers = #tpu.dot_dimension_numbers<[1], [0], [0], [1], [0, 0, 1, 1], [], []>, precision = #tpu.contract_precision<fp32>} : vector<8x425xf32>, vector<425x100xf32>, vector<8x100xf32> -> vector<8x100xf32>
    %c0_3 = arith.constant 0 : index
    %c0_4 = arith.constant 0 : index
    %3 = vector.load %arg2[%c0_3, %c0_4] : memref<8x100xf32, #tpu.memory_space<vmem>>, vector<8x100xf32>
    tpu.vector_store %arg2[%c0_3, %c0_4], %2 {strides = array<i32>} : memref<8x100xf32, #tpu.memory_space<vmem>>, vector<8x100xf32>,
    return
  }
}

</mosaic_0001>

<bundles_post_ra>
// kernel: tile.9
= control target key start
LH: loop header
LB: loop body
LE: loop exit
PB: predicated region body
PF: predicated region fallthrough
CT: control target
= control target key end

     0   :  { %vm127_vm0 = vcmask 1047556   ;;  %vm129_vm1 = vcmask 203776   ;;  %s334_s27 = smov 50   ;;  %s335_s7 = smov 25   ;;  %vm162_vm2 = vcmask 818776   ;;  %vm201_vm3 = vcmask 613776   ;;  %s485_s0 = inlined_call_operand.vmem [shape: f32[25,4,25], index: 0, kind: input, shape index: {}]   ;;  %s486_s1 = inlined_call_operand.vmem [shape: f32[25,100], index: 1, kind: output, shape index: {}]  }
   0x1   :  { %v311_v0 = vld [vmem:[%s485_s0 + $0x1c] sm:$0xf]  ;;  %v312_v1 = vld [vmem:[%s485_s0 + $0x18] sm:$0xf]  ;;  %v313_v2 = vld [vmem:[%s485_s0 + $0x14] sm:$0xf] }
   0x2   :  { %93 = vst [vmem:[#allocation0 + $0x38] sm:$0xf] %v311_v0  ;;  %98 = vst [vmem:[#allocation0 + $0x30] sm:$0xf] %v312_v1  ;;  %v314_v3 = vld [vmem:[%s485_s0 + $0x10] sm:$0xf] }
   0x3   :  { %103 = vst [vmem:[#allocation0 + $0x28] sm:$0xf] %v313_v2  ;;  %v315_v4 = vld [vmem:[%s485_s0 + $0xc] sm:$0xf]  ;;  %v316_v5 = vld [vmem:[%s485_s0 + $0x8] sm:$0xf] }
   0x4   :  { %108 = vst [vmem:[#allocation0 + $0x20] sm:$0xf] %v314_v3  ;;  %113 = vst [vmem:[#allocation0 + $0x18] sm:$0xf] %v315_v4  ;;  %v317_v6 = vld [vmem:[%s485_s0 + $0x4] sm:$0xf] }
   0x5   :  { %118 = vst [vmem:[#allocation0 + $0x10] sm:$0xf] %v316_v5  ;;  %v123_v7 = vld [vmem:[%s485_s0] sm:$0xf]  ;;  %122 = vst [vmem:[#allocation0 + $0x8] sm:$0xf] %v317_v6 }
   0x6   :  { %124 = vst [vmem:[#allocation0] sm:$0xf] %v123_v7  ;;  %v294_v8 = vld [vmem:[%s485_s0 + $0x60] sm:$0xf]  ;;  %v303_v9 = vld [vmem:[%s485_s0 + $0x3c] sm:$0xf] }
   0x7   :  { %v304_v10 = vld [vmem:[%s485_s0 + $0x38] sm:$0xf]  ;;  %8 = vst [vmem:[#allocation0 + $0xc0] sm:$0xf] %v294_v8  ;;  %53 = vst [vmem:[#allocation0 + $0x78] sm:$0xf] %v303_v9 }
   0x8   :  { %58 = vst [vmem:[#allocation0 + $0x70] sm:$0xf] %v304_v10  ;;  %v305_v11 = vld [vmem:[%s485_s0 + $0x34] sm:$0xf]  ;;  %v306_v12 = vld [vmem:[%s485_s0 + $0x30] sm:$0xf] }
   0x9   :  { %v307_v13 = vld [vmem:[%s485_s0 + $0x2c] sm:$0xf]  ;;  %63 = vst [vmem:[#allocation0 + $0x68] sm:$0xf] %v305_v11  ;;  %68 = vst [vmem:[#allocation0 + $0x60] sm:$0xf] %v306_v12 }
   0xa   :  { %73 = vst [vmem:[#allocation0 + $0x58] sm:$0xf] %v307_v13  ;;  %v308_v14 = vld [vmem:[%s485_s0 + $0x28] sm:$0xf]  ;;  %v309_v15 = vld [vmem:[%s485_s0 + $0x24] sm:$0xf] }
   0xb   :  { %v310_v16 = vld [vmem:[%s485_s0 + $0x20] sm:$0xf]  ;;  %78 = vst [vmem:[#allocation0 + $0x50] sm:$0xf] %v308_v14  ;;  %83 = vst [vmem:[#allocation0 + $0x48] sm:$0xf] %v309_v15 }
   0xc   :  { %88 = vst [vmem:[#allocation0 + $0x40] sm:$0xf] %v310_v16  ;;  %v295_v17 = vld [vmem:[%s485_s0 + $0x5c] sm:$0xf]  ;;  %v296_v18 = vld [vmem:[%s485_s0 + $0x58] sm:$0xf] }
   0xd   :  { %v297_v19 = vld [vmem:[%s485_s0 + $0x54] sm:$0xf]  ;;  %13 = vst [vmem:[#allocation0 + $0xb8] sm:$0xf] %v295_v17  ;;  %18 = vst [vmem:[#allocation0 + $0xb0] sm:$0xf] %v296_v18 }
   0xe   :  { %23 = vst [vmem:[#allocation0 + $0xa8] sm:$0xf] %v297_v19  ;;  %v298_v20 = vld [vmem:[%s485_s0 + $0x50] sm:$0xf]  ;;  %v299_v21 = vld [vmem:[%s485_s0 + $0x4c] sm:$0xf] }
   0xf   :  { %v300_v22 = vld [vmem:[%s485_s0 + $0x48] sm:$0xf]  ;;  %28 = vst [vmem:[#allocation0 + $0xa0] sm:$0xf] %v298_v20  ;;  %33 = vst [vmem:[#allocation0 + $0x98] sm:$0xf] %v299_v21 }
  0x10   :  { %38 = vst [vmem:[#allocation0 + $0x90] sm:$0xf] %v300_v22  ;;  %v301_v23 = vld [vmem:[%s485_s0 + $0x44] sm:$0xf]  ;;  %v302_v24 = vld [vmem:[%s485_s0 + $0x40] sm:$0xf] }
  0x11   :  { %v157_v25 = vld [vmem:[#allocation0 + $0x3] ss:$8 sm:$0xf0]   ;;  %43 = vst [vmem:[#allocation0 + $0x88] sm:$0xf] %v301_v23  ;;  %s333_s0 = smov 75  }
  0x12   :  { %48 = vst [vmem:[#allocation0 + $0x80] sm:$0xf] %v302_v24  ;;  %v155_v26 = vld [vmem:[#allocation0 + $0x3] ss:$8 sm:$0xf]   ;;  %vm240_vm4 = vcmask 408776  }
  0x13   :  { %v159_v27 = vsel %vm127_vm0, %v157_v25, %v155_v26  ;;  %v187_v28 = vld [vmem:[#allocation0 + $0xc3] sm:$0x1]   ;;  %v194_v32 = vld [vmem:[#allocation0 + $0x2] ss:$8 sm:$0xf]  }
  0x14   :  { %160 = vrot.lane.b32.xlu0 %v159_v27, %s333_s0  ;;  %188 = vrot.lane.b32.xlu1 %v187_v28, %s333_s0  ;;  %v167_v29 = vld [vmem:[#allocation0 + $0x43] ss:$8 sm:$0xf0]   ;;  %v196_v33 = vld [vmem:[#allocation0 + $0x2] ss:$8 sm:$0xf0]  }
  0x15   :  { %v165_v30 = vld [vmem:[#allocation0 + $0x43] ss:$8 sm:$0xf]   ;;  %v206_v35 = vld [vmem:[#allocation0 + $0x42] ss:$8 sm:$0xf0]   ;;  %v198_v39 = vsel %vm127_vm0, %v196_v33, %v194_v32 }
  0x16   :  { %v169_v31 = vsel %vm127_vm0, %v167_v29, %v165_v30  ;;  %v178_v34 = vld [vmem:[#allocation0 + $0x83] ss:$8 sm:$0xf0]   ;;  %v204_v37 = vld [vmem:[#allocation0 + $0x42] ss:$8 sm:$0xf]  }
  0x17   :  { %v217_v41 = vld [vmem:[#allocation0 + $0x82] ss:$8 sm:$0xf0]   ;;  %v208_v42 = vsel %vm127_vm0, %v206_v35, %v204_v37  ;;  %v125_v43 = vld [vmem:[#allocation0] ss:$8 sm:$0xf]  }
  0x18   :  { %170 = vrot.lane.b32.xlu0 %v169_v31, %s333_s0  ;;  %v233_v44 = vld [vmem:[#allocation0 + $0x1] ss:$8 sm:$0xf]   ;;  %v126_v46 = vld [vmem:[#allocation0] ss:$8 sm:$0xf0]  }
  0x19   :  { %v176_v36 = vld [vmem:[#allocation0 + $0x83] ss:$8 sm:$0xf]   ;;  %v215_v40 = vld [vmem:[#allocation0 + $0x82] ss:$8 sm:$0xf]   ;;  %v128_v49 = vsel %vm127_vm0, %v126_v46, %v125_v43 }
  0x1a   :  { %v180_v38 = vsel %vm127_vm0, %v178_v34, %v176_v36  ;;  %v235_v45 = vld [vmem:[#allocation0 + $0x1] ss:$8 sm:$0xf0]   ;;  %v150_v47 = vld [vmem:[#allocation0 + $0xc0] sm:$0x1]   ;;  %v219_v48 = vsel %vm127_vm0, %v217_v41, %v215_v40  ;;  %130 = vst.msk [vmem:[%s486_s1] sm:$0xff] %vm129_vm1, %v128_v49  }
  0x1b   :  { %181 = vrot.lane.b32.xlu1 %v180_v38, %s333_s0  ;;  %320 = vst.msk [vmem:[%s486_s1 + $0x18] sm:$0x1] %vm129_vm1, %v150_v47   ;;  %v132_v50 = vld [vmem:[#allocation0 + $0x40] ss:$8 sm:$0xf]   ;;  %v237_v59 = vsel %vm127_vm0, %v235_v45, %v233_v44 }
  0x1c   :  { %199 = vrot.lane.b32.xlu0 %v198_v39, %s334_s27  ;;  %v134_v51 = vld [vmem:[#allocation0 + $0x40] ss:$8 sm:$0xf0]   ;;  %v226_v55 = vld [vmem:[#allocation0 + $0xc2] sm:$0x1]  }
  0x1d   :  { %v136_v52 = vsel %vm127_vm0, %v134_v51, %v132_v50  ;;  %v141_v53 = vld [vmem:[#allocation0 + $0x80] ss:$8 sm:$0xf]   ;;  %v243_v57 = vld [vmem:[#allocation0 + $0x41] ss:$8 sm:$0xf]  }
  0x1e   :  { %v143_v54 = vld [vmem:[#allocation0 + $0x80] ss:$8 sm:$0xf0]   ;;  %318 = vst.msk [vmem:[%s486_s1 + $0x8] sm:$0xff] %vm129_vm1, %v136_v52   ;;  %v265_v0 = vld [vmem:[#allocation0 + $0xc1] sm:$0x1]  }
  0x1f   :  { %209 = vrot.lane.b32.xlu1 %v208_v42, %s334_s27  ;;  %v145_v56 = vsel %vm127_vm0, %v143_v54, %v141_v53  ;;  %v245_v58 = vld [vmem:[#allocation0 + $0x41] ss:$8 sm:$0xf0]  }
  0x20   :  { %220 = vrot.lane.b32.xlu0 %v219_v48, %s334_s27  ;;  %319 = vst.msk [vmem:[%s486_s1 + $0x10] sm:$0xff] %vm129_vm1, %v145_v56   ;;  %v254_v60 = vld [vmem:[#allocation0 + $0x81] ss:$8 sm:$0xf]   ;;  %v247_v62 = vsel %vm127_vm0, %v245_v58, %v243_v57 }
  0x21   :  { %v256_v61 = vld [vmem:[#allocation0 + $0x81] ss:$8 sm:$0xf0]  }
  0x22   :  { %v258_v63 = vsel %vm127_vm0, %v256_v61, %v254_v60 }
  0x23   :  { %227 = vrot.lane.b32.xlu1 %v226_v55, %s334_s27 }
  0x24   :  { %238 = vrot.lane.b32.xlu0 %v237_v59, %s335_s7 }
  0x27   :  { %248 = vrot.lane.b32.xlu1 %v247_v62, %s335_s7 }
  0x28   :  { %259 = vrot.lane.b32.xlu0 %v258_v63, %s335_s7 }
  0x2b   :  { %266 = vrot.lane.b32.xlu1 %v265_v0, %s335_s7 }
  0x86   :  { %v161_v1 = vpop.permute.xlu0 %160   ;;  %v189_v2 = vpop.permute.xlu1 %188  }
  0x87   :  { %163 = vst.msk [vmem:[%s486_s1] sm:$0xff] %vm162_vm2, %v161_v1   ;;  %323 = vst.msk [vmem:[%s486_s1 + $0x18] sm:$0x1] %vm162_vm2, %v189_v2  }
  0x8a   :  { %v171_v3 = vpop.permute.xlu0 %170  }
  0x8b   :  { %321 = vst.msk [vmem:[%s486_s1 + $0x8] sm:$0xff] %vm162_vm2, %v171_v3  }
  0x8d   :  { %v182_v4 = vpop.permute.xlu1 %181  }
  0x8e   :  { %322 = vst.msk [vmem:[%s486_s1 + $0x10] sm:$0xff] %vm162_vm2, %v182_v4   ;;  %v200_v5 = vpop.permute.xlu0 %199  }
  0x8f   :  { %202 = vst.msk [vmem:[%s486_s1] sm:$0xff] %vm201_vm3, %v200_v5  }
  0x91   :  { %v210_v6 = vpop.permute.xlu1 %209  }
  0x92   :  { %324 = vst.msk [vmem:[%s486_s1 + $0x8] sm:$0xff] %vm201_vm3, %v210_v6   ;;  %v221_v7 = vpop.permute.xlu0 %220  }
  0x93   :  { %325 = vst.msk [vmem:[%s486_s1 + $0x10] sm:$0xff] %vm201_vm3, %v221_v7  }
  0x95   :  { %v228_v8 = vpop.permute.xlu1 %227  }
  0x96   :  { %326 = vst.msk [vmem:[%s486_s1 + $0x18] sm:$0x1] %vm201_vm3, %v228_v8   ;;  %v239_v9 = vpop.permute.xlu0 %238  }
  0x97   :  { %241 = vst.msk [vmem:[%s486_s1] sm:$0xff] %vm240_vm4, %v239_v9  }
  0x99   :  { %v249_v10 = vpop.permute.xlu1 %248  }
  0x9a   :  { %327 = vst.msk [vmem:[%s486_s1 + $0x8] sm:$0xff] %vm240_vm4, %v249_v10   ;;  %v260_v11 = vpop.permute.xlu0 %259  }
  0x9b   :  { %328 = vst.msk [vmem:[%s486_s1 + $0x10] sm:$0xff] %vm240_vm4, %v260_v11  }
  0x9d   :  { %v267_v12 = vpop.permute.xlu1 %266  }
  0x9e   :  { %329 = vst.msk [vmem:[%s486_s1 + $0x18] sm:$0x1] %vm240_vm4, %v267_v12  }

// kernel: module_attribute_forward.1
= control target key start
LH: loop header
LB: loop body
LE: loop exit
PB: predicated region body
PF: predicated region fallthrough
CT: control target
= control target key end

     0   :  { %vm69_vm0 = vcmask 334848   ;;  %vm73_vm1 = vcmask 1040384   ;;  %vm1671_vm2 = vcmask 818176   ;;  %s3308_s1 = inlined_call_operand.vmem [shape: f32[425,100], index: 1, kind: input, shape index: {}]   ;;  %s3309_s0 = inlined_call_operand.vmem [shape: f32[8,425], index: 0, kind: input, shape index: {}]   ;;  %s3310_s2 = inlined_call_operand.vmem [shape: f32[8,100], index: 2, kind: output, shape index: {}]  }
   0x1   :  { %v31_v0 = vld [vmem:[%s3308_s1 + $0x80] sm:$0xff]  ;;  %v32_v1 = vld [vmem:[%s3308_s1 + $0x88] sm:$0xff]  ;;  %v33_v7 = vld [vmem:[%s3308_s1 + $0x90] sm:$0xff] }
   0x2   :  { %v15_v2 = vld [vmem:[%s3308_s1] sm:$0xff]  ;;  %v126_v3 = vand.u32 4294901760, %v31_v0  ;;  %v129_v4 = vand.u32 4294901760, %v32_v1  ;;  %v16_v5 = vld [vmem:[%s3308_s1 + $0x8] sm:$0xff]  ;;  %v34_v8 = vld [vmem:[%s3308_s1 + $0x98] sm:$0xff]  ;;  %v132_v10 = vand.u32 4294901760, %v33_v7 }
   0x3   :  { %v78_v6 = vand.u32 4294901760, %v15_v2  ;;  %v81_v9 = vand.u32 4294901760, %v16_v5  ;;  %v135_v11 = vand.u32 4294901760, %v34_v8  ;;  %v17_v12 = vld [vmem:[%s3308_s1 + $0x10] sm:$0xff]  ;;  %v18_v13 = vld [vmem:[%s3308_s1 + $0x18] sm:$0xff]  ;;  %v35_v18 = vld [vmem:[%s3308_s1 + $0xa0] sm:$0xff] }
   0x4   :  { %v2328_v14 = vpack.c.bf16 %v129_v4, %v126_v3  ;;  %v84_v16 = vand.u32 4294901760, %v17_v12  ;;  %v87_v17 = vand.u32 4294901760, %v18_v13  ;;  %v36_v19 = vld [vmem:[%s3308_s1 + $0xa8] sm:$0xff]  ;;  %v19_v23 = vld [vmem:[%s3308_s1 + $0x20] sm:$0xff]  ;;  %v2351_v25 = vsub.f32 %v33_v7, %v132_v10  ;;  %v37_v37 = vld [vmem:[%s3308_s1 + $0xb0] sm:$0xff] }
   0x5   :  { %v2330_v15 = vsub.f32 %v15_v2, %v78_v6  ;;  %v2338_v20 = vpack.c.bf16 %v81_v9, %v78_v6  ;;  %v2340_v21 = vsub.f32 %v16_v5, %v81_v9  ;;  %v2342_v22 = vpack.c.bf16 %v135_v11, %v132_v10  ;;  %v20_v24 = vld [vmem:[%s3308_s1 + $0x28] sm:$0xff]  ;;  %v38_v42 = vld [vmem:[%s3308_s1 + $0xb8] sm:$0xff]  ;;  %v21_v55 = vld [vmem:[%s3308_s1 + $0x30] sm:$0xff] }
   0x6   :  { %1888 = vmatprep.subr.bf16.mxu0 %v2328_v14  ;;  %v2353_v26 = vsub.f32 %v34_v8, %v135_v11  ;;  %v2355_v27 = vpack.c.bf16 %v87_v17, %v84_v16  ;;  %v2357_v28 = vsub.f32 %v17_v12, %v84_v16  ;;  %v138_v29 = vand.u32 4294901760, %v35_v18  ;;  %v22_v56 = vld [vmem:[%s3308_s1 + $0x38] sm:$0xff]  ;;  %v39_v5 = vld [vmem:[%s3308_s1 + $0xc0] sm:$0xff]  ;;  %v40_v6 = vld [vmem:[%s3308_s1 + $0xc8] sm:$0xff] }
   0x7   :  { %1890 = vmatpush3.bf16.msra.mxu0 %v2338_v20  ;;  %v141_v30 = vand.u32 4294901760, %v36_v19  ;;  %v2360_v31 = vsub.f32 %v31_v0, %v126_v3  ;;  %v2362_v32 = vsub.f32 %v32_v1, %v129_v4  ;;  %v90_v33 = vand.u32 4294901760, %v19_v23  ;;  %v23_v11 = vld [vmem:[%s3308_s1 + $0x40] sm:$0xff] }
   0x8   :  { %1892 = vmatprep.subr.bf16.mxu0 %v2342_v22  ;;  %v93_v34 = vand.u32 4294901760, %v20_v24  ;;  %v3327_v35 = vand.u32 4294901760, %v2330_v15  ;;  %v3326_v36 = vand.u32 4294901760, %v2340_v21  ;;  %v2370_v38 = vsub.f32 %v18_v13, %v87_v17 }
   0x9   :  { %v2372_v39 = vpack.c.bf16 %v141_v30, %v138_v29  ;;  %v2374_v40 = vsub.f32 %v35_v18, %v138_v29  ;;  %v3332_v41 = vand.u32 4294901760, %v2360_v31  ;;  %v2380_v43 = vsub.f32 %v36_v19, %v141_v30  ;;  %v24_v29 = vld [vmem:[%s3308_s1 + $0x48] sm:$0xff] }
   0xa   :  { %v3329_v44 = vand.u32 4294901760, %v2362_v32  ;;  %v2383_v45 = vpack.c.bf16 %v93_v34, %v90_v33  ;;  %v2385_v46 = vsub.f32 %v19_v23, %v90_v33  ;;  %v193_v48 = vsub.f32 %v2330_v15, %v3327_v35 }
   0xb   :  { %1894 = vmatpush3.bf16.msra.mxu0 %v2355_v27  ;;  %v305_v47 = vsub.f32 %v2360_v31, %v3332_v41  ;;  %v200_v49 = vsub.f32 %v2340_v21, %v3326_v36  ;;  %v144_v50 = vand.u32 4294901760, %v37_v37  ;;  %v147_v52 = vand.u32 4294901760, %v38_v42 }
   0xc   :  { %1896 = vmatprep.subr.bf16.mxu0 %v2372_v39  ;;  %v312_v51 = vsub.f32 %v2362_v32, %v3329_v44  ;;  %v3324_v53 = vand.u32 4294901760, %v2351_v25  ;;  %v3323_v54 = vand.u32 4294901760, %v2353_v26  ;;  %v2409_v58 = vsub.f32 %v20_v24, %v93_v34 }
   0xd   :  { %v306_v57 = vand.u32 4294901760, %v305_v47  ;;  %v194_v59 = vand.u32 4294901760, %v193_v48  ;;  %v201_v60 = vand.u32 4294901760, %v200_v49  ;;  %v2411_v62 = vpack.c.bf16 %v147_v52, %v144_v50 }
   0xe   :  { %v313_v61 = vand.u32 4294901760, %v312_v51  ;;  %v2413_v63 = vsub.f32 %v37_v37, %v144_v50  ;;  %v319_v0 = vsub.f32 %v2351_v25, %v3324_v53  ;;  %v326_v2 = vsub.f32 %v2353_v26, %v3323_v54 }
   0xf   :  { %1898 = vmatpush3.bf16.msra.mxu0 %v2383_v45  ;;  %v1921_v1 = vpack.c.bf16 %v201_v60, %v194_v59  ;;  %v96_v3 = vand.u32 4294901760, %v21_v55  ;;  %v99_v4 = vand.u32 4294901760, %v22_v56  ;;  %v3322_v9 = vand.u32 4294901760, %v2357_v28 }
  0x10   :  { %v1919_v7 = vpack.c.bf16 %v313_v61, %v306_v57  ;;  %1900 = vmatprep.subr.bf16.mxu0 %v2411_v62  ;;  %v320_v8 = vand.u32 4294901760, %v319_v0  ;;  %v3319_v10 = vand.u32 4294901760, %v2370_v38  ;;  %v2434_v12 = vsub.f32 %v38_v42, %v147_v52  ;;  %v42_v57 = vld [vmem:[%s3308_s1 + $0xd8] sm:$0xff] }
  0x11   :  { %v327_v13 = vand.u32 4294901760, %v326_v2  ;;  %v2436_v16 = vpack.c.bf16 %v99_v4, %v96_v3  ;;  %v2438_v17 = vsub.f32 %v21_v55, %v96_v3  ;;  %v207_v18 = vsub.f32 %v2357_v28, %v3322_v9 }
  0x12   :  { %1920 = vmatprep.subr.bf16.mxu1 %v1919_v7  ;;  %v214_v19 = vsub.f32 %v2370_v38, %v3319_v10  ;;  %v150_v23 = vand.u32 4294901760, %v39_v5  ;;  %v153_v24 = vand.u32 4294901760, %v40_v6  ;;  %v3317_v33 = vand.u32 4294901760, %v2374_v40 }
  0x13   :  { %1922 = vmatpush3.bf16.msra.mxu1 %v1921_v1  ;;  %v1923_v30 = vpack.c.bf16 %v327_v13, %v320_v8  ;;  %1902 = vmatpush3.bf16.msra.mxu0 %v2436_v16  ;;  %v3316_v34 = vand.u32 4294901760, %v2380_v43  ;;  %v102_v37 = vand.u32 4294901760, %v23_v11  ;;  %v2452_v42 = vsub.f32 %v22_v56, %v99_v4  ;;  %v41_v56 = vld [vmem:[%s3308_s1 + $0xd0] sm:$0xff] }
  0x14   :  { %v208_v47 = vand.u32 4294901760, %v207_v18  ;;  %v215_v48 = vand.u32 4294901760, %v214_v19  ;;  %v2454_v49 = vpack.c.bf16 %v153_v24, %v150_v23  ;;  %v2456_v50 = vsub.f32 %v39_v5, %v150_v23  ;;  %v25_v1 = vld [vmem:[%s3308_s1 + $0x50] sm:$0xff]  ;;  %v26_v18 = vld [vmem:[%s3308_s1 + $0x58] sm:$0xff] }
  0x15   :  { %1924 = vmatprep.subr.bf16.mxu1 %v1923_v30  ;;  %v333_v51 = vsub.f32 %v2374_v40, %v3317_v33  ;;  %v340_v52 = vsub.f32 %v2380_v43, %v3316_v34  ;;  %v105_v55 = vand.u32 4294901760, %v24_v29  ;;  %v2471_v60 = vsub.f32 %v40_v6, %v153_v24 }
  0x16   :  { %v1925_v59 = vpack.c.bf16 %v215_v48, %v208_v47  ;;  %1904 = vmatprep.subr.bf16.mxu0 %v2454_v49  ;;  %v3314_v61 = vand.u32 4294901760, %v2385_v46  ;;  %v3313_v0 = vand.u32 4294901760, %v2409_v58  ;;  %v2480_v5 = vsub.f32 %v23_v11, %v102_v37 }
  0x17   :  { %v334_v2 = vand.u32 4294901760, %v333_v51  ;;  %v341_v3 = vand.u32 4294901760, %v340_v52  ;;  %v2478_v4 = vpack.c.bf16 %v105_v55, %v102_v37  ;;  %v156_v8 = vand.u32 4294901760, %v41_v56 }
  0x18   :  { %1926 = vmatpush3.bf16.msra.mxu1 %v1925_v59  ;;  %v221_v6 = vsub.f32 %v2385_v46, %v3314_v61  ;;  %v228_v7 = vsub.f32 %v2409_v58, %v3313_v0  ;;  %v159_v13 = vand.u32 4294901760, %v42_v57  ;;  %v3312_v11 = vand.u32 4294901760, %v2413_v63 }
  0x19   :  { %v1927_v19 = vpack.c.bf16 %v341_v3, %v334_v2  ;;  %1906 = vmatpush3.bf16.msra.mxu0 %v2478_v4  ;;  %v3311_v23 = vand.u32 4294901760, %v2434_v12  ;;  %v108_v24 = vand.u32 4294901760, %v25_v1  ;;  %v2494_v30 = vsub.f32 %v24_v29, %v105_v55  ;;  %v43_v29 = vld [vmem:[%s3308_s1 + $0xe0] sm:$0xff]  ;;  %v44_v55 = vld [vmem:[%s3308_s1 + $0xe8] sm:$0xff] }
  0x1a   :  { %v222_v37 = vand.u32 4294901760, %v221_v6  ;;  %v229_v47 = vand.u32 4294901760, %v228_v7  ;;  %v2496_v48 = vpack.c.bf16 %v159_v13, %v156_v8  ;;  %v2498_v51 = vsub.f32 %v41_v56, %v156_v8  ;;  %v27_v8 = vld [vmem:[%s3308_s1 + $0x60] sm:$0xff] }
  0x1b   :  { %1928 = vmatprep.subr.bf16.mxu1 %v1927_v19  ;;  %v347_v52 = vsub.f32 %v2413_v63, %v3312_v11  ;;  %v354_v59 = vsub.f32 %v2434_v12, %v3311_v23  ;;  %v111_v2 = vand.u32 4294901760, %v26_v18  ;;  %v2513_v56 = vsub.f32 %v42_v57, %v159_v13 }
  0x1c   :  { %v1929_v3 = vpack.c.bf16 %v229_v47, %v222_v37  ;;  %1908 = vmatprep.subr.bf16.mxu0 %v2496_v48  ;;  %v3315_v6 = vand.u32 4294901760, %v2438_v17  ;;  %v3318_v7 = vand.u32 4294901760, %v2452_v42  ;;  %v2522_v0 = vsub.f32 %v25_v1, %v108_v24 }
  0x1d   :  { %v348_v19 = vand.u32 4294901760, %v347_v52  ;;  %v355_v23 = vand.u32 4294901760, %v354_v59  ;;  %v2520_v11 = vpack.c.bf16 %v111_v2, %v108_v24  ;;  %v162_v37 = vand.u32 4294901760, %v43_v29  ;;  %v28_v52 = vld [vmem:[%s3308_s1 + $0x68] sm:$0xff] }
  0x1e   :  { %1930 = vmatpush3.bf16.msra.mxu1 %v1929_v3  ;;  %v235_v57 = vsub.f32 %v2438_v17, %v3315_v6  ;;  %v242_v13 = vsub.f32 %v2452_v42, %v3318_v7  ;;  %v165_v47 = vand.u32 4294901760, %v44_v55  ;;  %v3321_v1 = vand.u32 4294901760, %v2456_v50 }
  0x1f   :  { %3361 = vst [vmem:[#allocation2_spill] sm:$0xff] %v2520_v11  ;;  %v1931_v59 = vpack.c.bf16 %v355_v23, %v348_v19  ;;  %1910 = vmatpush3.bf16.msra.mxu0 %v2520_v11  ;;  %v3320_v24 = vand.u32 4294901760, %v2471_v60  ;;  %v114_v3 = vand.u32 4294901760, %v27_v8  ;;  %v2536_v61 = vsub.f32 %v26_v18, %v111_v2  ;;  %v45_v18 = vld [vmem:[%s3308_s1 + $0xf0] sm:$0xff]  ;;  %v46_v2 = vld [vmem:[%s3308_s1 + $0xf8] sm:$0xff] }
  0x20   :  { %v236_v6 = vand.u32 4294901760, %v235_v57  ;;  %v243_v34 = vand.u32 4294901760, %v242_v13  ;;  %v2538_v33 = vpack.c.bf16 %v165_v47, %v162_v37  ;;  %v2540_v7 = vsub.f32 %v43_v29, %v162_v37 }
  0x21   :  { %1932 = vmatprep.subr.bf16.mxu1 %v1931_v59  ;;  %v361_v23 = vsub.f32 %v2456_v50, %v3321_v1  ;;  %v368_v19 = vsub.f32 %v2471_v60, %v3320_v24  ;;  %v117_v10 = vand.u32 4294901760, %v28_v52  ;;  %v2555_v29 = vsub.f32 %v44_v55, %v165_v47  ;;  %v29_v59 = vld [vmem:[%s3308_s1 + $0x70] sm:$0xff] }
  0x22   :  { %3362 = vst [vmem:[#allocation3_spill] sm:$0xff] %v2538_v33  ;;  %v1933_v57 = vpack.c.bf16 %v243_v34, %v236_v6  ;;  %1912 = vmatprep.subr.bf16.mxu0 %v2538_v33  ;;  %v3325_v13 = vand.u32 4294901760, %v2480_v5  ;;  %v3328_v37 = vand.u32 4294901760, %v2494_v30  ;;  %v2564_v54 = vsub.f32 %v27_v8, %v114_v3 }
  0x23   :  { %v362_v24 = vand.u32 4294901760, %v361_v23  ;;  %v369_v1 = vand.u32 4294901760, %v368_v19  ;;  %v2562_v9 = vpack.c.bf16 %v117_v10, %v114_v3  ;;  %v168_v6 = vand.u32 4294901760, %v45_v18  ;;  %v30_v23 = vld [vmem:[%s3308_s1 + $0x78] sm:$0xff] }
  0x24   :  { %1934 = vmatpush3.bf16.msra.mxu1 %v1933_v57  ;;  %v249_v34 = vsub.f32 %v2480_v5, %v3325_v13  ;;  %v256_v55 = vsub.f32 %v2494_v30, %v3328_v37  ;;  %v171_v47 = vand.u32 4294901760, %v46_v2  ;;  %v3331_v8 = vand.u32 4294901760, %v2498_v51 }
  0x25   :  { %3363 = vst [vmem:[#allocation4_spill] sm:$0xff] %v2562_v9  ;;  %v1935_v19 = vpack.c.bf16 %v369_v1, %v362_v24  ;;  %1914 = vmatpush3.bf16.msra.mxu0 %v2562_v9  ;;  %v3330_v3 = vand.u32 4294901760, %v2513_v56  ;;  %v120_v57 = vand.u32 4294901760, %v29_v59  ;;  %v2578_v53 = vsub.f32 %v28_v52, %v117_v10  ;;  %v12_v10 = vld [vmem:[%s3309_s0 + $0x8] sm:$0xff] }
  0x26   :  { %v250_v13 = vand.u32 4294901760, %v249_v34  ;;  %v257_v36 = vand.u32 4294901760, %v256_v55  ;;  %v2580_v35 = vpack.c.bf16 %v171_v47, %v168_v6  ;;  %v2582_v37 = vsub.f32 %v45_v18, %v168_v6  ;;  %v11_v6 = vld [vmem:[%s3309_s0] sm:$0xff] }
  0x27   :  { %1936 = vmatprep.subr.bf16.mxu1 %v1935_v19  ;;  %v375_v1 = vsub.f32 %v2498_v51, %v3331_v8  ;;  %v382_v24 = vsub.f32 %v2513_v56, %v3330_v3  ;;  %v123_v44 = vand.u32 4294901760, %v30_v23  ;;  %v2594_v34 = vsub.f32 %v46_v2, %v171_v47 }
  0x28   :  { %3364 = vst [vmem:[#allocation5_spill] sm:$0xff] %v2580_v35  ;;  %v1937_v52 = vpack.c.bf16 %v257_v36, %v250_v13  ;;  %1916 = vmatprep.subr.bf16.mxu0 %v2580_v35  ;;  %v3335_v18 = vand.u32 4294901760, %v2522_v0  ;;  %v3336_v55 = vand.u32 4294901760, %v2536_v61  ;;  %v2603_v41 = vsub.f32 %v29_v59, %v120_v57 }
  0x29   :  { %v376_v19 = vand.u32 4294901760, %v375_v1  ;;  %v383_v3 = vand.u32 4294901760, %v382_v24  ;;  %v2601_v8 = vpack.c.bf16 %v123_v44, %v120_v57  ;;  %v2611_v13 = vand.u32 4294901760, %v12_v10 }
  0x2a   :  { %1938 = vmatpush3.bf16.msra.mxu1 %v1937_v52  ;;  %v263_v36 = vsub.f32 %v2522_v0, %v3335_v18  ;;  %v270_v2 = vsub.f32 %v2536_v61, %v3336_v55  ;;  %v3339_v47 = vand.u32 4294901760, %v2540_v7  ;;  %v3345_v1 = vand.u32 4294901760, %v2555_v29 }
  0x2b   :  { %3365 = vst [vmem:[#allocation6_spill] sm:$0xff] %v2601_v8  ;;  %3366 = vst [vmem:[#allocation7_spill] sm:$0xff] %v2611_v13  ;;  %v1939_v35 = vpack.c.bf16 %v383_v3, %v376_v19  ;;  %1918 = vmatpush3.bf16.msra.mxu0 %v2601_v8  ;;  %v1951_v59 = vpack.c.bf16 %v2362_v32, %v2360_v31  ;;  %v2618_v57 = vand.u32 4294901760, %v11_v6  ;;  %414 = vmatprep.mubr.f32.mxu1 %v2611_v13 }
  0x2c   :  { %v264_v24 = vand.u32 4294901760, %v263_v36  ;;  %v271_v52 = vand.u32 4294901760, %v270_v2  ;;  %v2621_v18 = vsub.f32 %v12_v10, %v2611_v13  ;;  %v389_v55 = vsub.f32 %v2540_v7, %v3339_v47 }
  0x2d   :  { %1940 = vmatprep.subr.bf16.mxu1 %v1939_v35  ;;  %v396_v3 = vsub.f32 %v2555_v29, %v3345_v1  ;;  %1952 = vmatprep.subr.bf16.mxu0 %v1951_v59  ;;  %v2631_v19 = vsub.f32 %v11_v6, %v2618_v57  ;;  %v3344_v36 = vand.u32 4294901760, %v2564_v54  ;;  %v3346_v10 = vand.u32 4294901760, %v2578_v53 }
  0x2e   :  { %v2635_v2 = vsub.f32 %v30_v23, %v123_v44  ;;  %v1941_v8 = vpack.c.bf16 %v271_v52, %v264_v24  ;;  %v3347_v47 = vand.u32 4294901760, %v2621_v18  ;;  %v390_v9 = vand.u32 4294901760, %v389_v55 }
  0x2f   :  { %v397_v13 = vand.u32 4294901760, %v396_v3  ;;  %v181_v35 = vand.u32 4294901760, %v2631_v19  ;;  %v277_v59 = vsub.f32 %v2564_v54, %v3344_v36  ;;  %v284_v6 = vsub.f32 %v2578_v53, %v3346_v10 }
  0x30   :  { %1942 = vmatpush3.bf16.msra.mxu1 %v1941_v8  ;;  %v176_v44 = vsub.f32 %v2621_v18, %v3347_v47  ;;  %v1953_v23 = vpack.c.bf16 %v2340_v21, %v2330_v15  ;;  %v3352_v55 = vand.u32 4294901760, %v2582_v37  ;;  %v3355_v24 = vand.u32 4294901760, %v2594_v34 }
  0x31   :  { %v1943_v52 = vpack.c.bf16 %v397_v13, %v390_v9  ;;  %v182_v3 = vsub.f32 %v2631_v19, %v181_v35  ;;  %v278_v36 = vand.u32 4294901760, %v277_v59  ;;  %v285_v1 = vand.u32 4294901760, %v284_v6 }
  0x32   :  { %v177_v10 = vand.u32 4294901760, %v176_v44  ;;  %v403_v8 = vsub.f32 %v2582_v37, %v3352_v55  ;;  %v410_v47 = vsub.f32 %v2594_v34, %v3355_v24  ;;  %v3354_v33 = vand.u32 4294901760, %v2603_v41 }
  0x33   :  { %1944 = vmatprep.subr.bf16.mxu1 %v1943_v52  ;;  %v183_v11 = vand.u32 4294901760, %v182_v3  ;;  %v1945_v9 = vpack.c.bf16 %v285_v1, %v278_v36  ;;  %v1955_v13 = vpack.c.bf16 %v2353_v26, %v2351_v25  ;;  %v3353_v59 = vand.u32 4294901760, %v2635_v2 }
  0x34   :  { %178 = vmatprep.mubr.f32.mxu0 %v177_v10  ;;  %v404_v6 = vand.u32 4294901760, %v403_v8  ;;  %v411_v44 = vand.u32 4294901760, %v410_v47  ;;  %v291_v55 = vsub.f32 %v2603_v41, %v3354_v33  ;;  %v1957_v3 = vpack.c.bf16 %v2370_v38, %v2357_v28 }
  0x35   :  { %184 = vmatmul.mubr.f32.vlgmr.msra.gmra.mrb[0].mxu0 %v183_v11  ;;  %1946 = vmatpush3.bf16.msra.mxu1 %v1945_v9  ;;  %v298_v52 = vsub.f32 %v2635_v2, %v3353_v59  ;;  %v1959_v10 = vpack.c.bf16 %v2380_v43, %v2374_v40  ;;  %v1961_v11 = vpack.c.bf16 %v2409_v58, %v2385_v46  ;;  %v3368_v9 = vand.u32 4294901760, %v2362_v32 }
  0x36   :  { %1954 = vmatpush3.bf16.msra.mxu0 %v1953_v23  ;;  %v1947_v1 = vpack.c.bf16 %v411_v44, %v404_v6  ;;  %v292_v36 = vand.u32 4294901760, %v291_v55  ;;  %551 = vmatprep.mubr.f32.mxu0 %v2621_v18  ;;  %v1963_v8 = vpack.c.bf16 %v2434_v12, %v2413_v63  ;;  %v3367_v55 = vand.u32 4294901760, %v2360_v31 }
  0x37   :  { %1956 = vmatprep.subr.bf16.mxu0 %v1955_v13  ;;  %v299_v47 = vand.u32 4294901760, %v298_v52  ;;  %v3369_v44 = vand.u32 4294901760, %v2330_v15  ;;  %v3370_v13 = vand.u32 4294901760, %v2340_v21  ;;  %v3371_v59 = vand.u32 4294901760, %v2351_v25 }
  0x38   :  { %1948 = vmatprep.subr.bf16.mxu1 %v1947_v1  ;;  %v2015_v6 = vpack.c.bf16 %v3368_v9, %v3367_v55  ;;  %v3372_v1 = vand.u32 4294901760, %v2353_v26  ;;  %v3373_v24 = vand.u32 4294901760, %v2357_v28  ;;  %v3375_v31 = vand.u32 4294901760, %v2374_v40 }
  0x39   :  { %v1949_v23 = vpack.c.bf16 %v299_v47, %v292_v36  ;;  %v2017_v52 = vpack.c.bf16 %v3370_v13, %v3369_v44  ;;  %v3374_v36 = vand.u32 4294901760, %v2370_v38  ;;  %v3376_v32 = vand.u32 4294901760, %v2380_v43  ;;  %v3391_v13 = vld [vmem:[#allocation4_spill] sm:$0xff] }
  0x3a   :  { %v2019_v33 = vpack.c.bf16 %v3372_v1, %v3371_v59  ;;  %1958 = vmatpush3.bf16.msra.mxu0 %v1957_v3  ;;  %v3377_v15 = vand.u32 4294901760, %v2385_v46  ;;  %v3378_v21 = vand.u32 4294901760, %v2409_v58  ;;  %v3379_v25 = vand.u32 4294901760, %v2413_v63  ;;  %v3392_v1 = vld [vmem:[#allocation5_spill] sm:$0xff] }
  0x3b   :  { %v2021_v47 = vpack.c.bf16 %v3374_v36, %v3373_v24  ;;  %v2023_v55 = vpack.c.bf16 %v3376_v32, %v3375_v31  ;;  %v3380_v26 = vand.u32 4294901760, %v2434_v12  ;;  %1950 = vmatpush3.bf16.msra.mxu1 %v1949_v23  ;;  %1960 = vmatprep.subr.bf16.mxu0 %v1959_v10  ;;  %v3381_v28 = vand.u32 4294901760, %v2438_v17  ;;  %v3393_v36 = vld [vmem:[#allocation6_spill] sm:$0xff] }
  0x3c   :  { %v2025_v9 = vpack.c.bf16 %v3378_v21, %v3377_v15  ;;  %v3382_v38 = vand.u32 4294901760, %v2452_v42  ;;  %v3383_v43 = vand.u32 4294901760, %v2456_v50  ;;  %v3384_v24 = vand.u32 4294901760, %v2471_v60  ;;  %1984 = vmatprep.subr.bf16.mxu1 %v2328_v14 }
  0x3d   :  { %v2027_v59 = vpack.c.bf16 %v3380_v26, %v3379_v25  ;;  %v3385_v58 = vand.u32 4294901760, %v2480_v5  ;;  %v3386_v3 = vand.u32 4294901760, %v2494_v30  ;;  %v1965_v12 = vpack.c.bf16 %v2452_v42, %v2438_v17 }
  0x3e   :  { %v2029_v40 = vpack.c.bf16 %v3382_v38, %v3381_v28  ;;  %v2031_v46 = vpack.c.bf16 %v3384_v24, %v3383_v43  ;;  %416 = vmatmul.mubr.f32.vlgmr.msra.gmra.mrb[0].mxu1 %v2618_v57  ;;  %1962 = vmatpush3.bf16.msra.mxu0 %v1961_v11  ;;  %v1967_v10 = vpack.c.bf16 %v2471_v60, %v2456_v50  ;;  %v3387_v23 = vand.u32 4294901760, %v2621_v18  ;;  %v3388_v18 = vld [vmem:[#allocation2_spill] sm:$0xff]  ;;  %v3389_v11 = vld [vmem:[#allocation3_spill] sm:$0xff]  ;;  %v2864_v28 = vld [vmem:[%s3308_s1 + $0x130] sm:$0xff] }
  0x3f   :  { %v2033_v63 = vpack.c.bf16 %v3386_v3, %v3385_v58  ;;  %1986 = vmatpush3.bf16.msra.mxu1 %v2338_v20  ;;  %1964 = vmatprep.subr.bf16.mxu0 %v1963_v8  ;;  %v1969_v44 = vpack.c.bf16 %v2494_v30, %v2480_v5  ;;  %v1971_v17 = vpack.c.bf16 %v2513_v56, %v2498_v51  ;;  %v3390_v8 = vld [vmem:[#allocation7_spill] sm:$0xff]  ;;  %v2288_v21 = vmov 0.0|0.0   ;;  %v2869_v38 = vld [vmem:[%s3308_s1 + $0x138] sm:$0xff]  ;;  %v2887_v58 = vld [vmem:[%s3308_s1 + $0x140] sm:$0xff] }
  0x40   :  { %1988 = vmatprep.subr.bf16.mxu1 %v2342_v22  ;;  %658 = vmatprep.mubr.f32.mxu1 %v3387_v23  ;;  %v1973_v42 = vpack.c.bf16 %v2536_v61, %v2522_v0  ;;  %v1975_v50 = vpack.c.bf16 %v2555_v29, %v2540_v7  ;;  %v1977_v60 = vpack.c.bf16 %v2578_v53, %v2564_v54  ;;  %v958_v24 = vand.u32 4294901760, %v2864_v28  ;;  %v2892_v3 = vld [vmem:[%s3308_s1 + $0x148] sm:$0xff] }
  0x41   :  { %v1979_v5 = vpack.c.bf16 %v2594_v34, %v2582_v37  ;;  %v1981_v30 = vpack.c.bf16 %v2635_v2, %v2603_v41  ;;  %v967_v23 = vand.u32 4294901760, %v2892_v3 }
  0x42   :  { %1966 = vmatpush3.bf16.msra.mxu0 %v1965_v12 }
  0x43   :  { %1990 = vmatpush3.bf16.msra.mxu1 %v2355_v27  ;;  %1968 = vmatprep.subr.bf16.mxu0 %v1967_v10  ;;  %v964_v10 = vand.u32 4294901760, %v2887_v58 }
  0x44   :  { %1992 = vmatprep.subr.bf16.mxu1 %v2372_v39 }
  0x46   :  { %1970 = vmatpush3.bf16.msra.mxu0 %v1969_v44  ;;  %v2915_v44 = vld [vmem:[%s3308_s1 + $0x158] sm:$0xff] }
  0x47   :  { %1994 = vmatpush3.bf16.msra.mxu1 %v2383_v45  ;;  %1972 = vmatprep.subr.bf16.mxu0 %v1971_v17  ;;  %v2923_v17 = vpack.c.bf16 %v967_v23, %v964_v10 }
  0x48   :  { %1996 = vmatprep.subr.bf16.mxu1 %v2411_v62 }
  0x4a   :  { %1974 = vmatpush3.bf16.msra.mxu0 %v1973_v42 }
  0x4b   :  { %1998 = vmatpush3.bf16.msra.mxu1 %v2436_v16  ;;  %1976 = vmatprep.subr.bf16.mxu0 %v1975_v50  ;;  %v973_v50 = vand.u32 4294901760, %v2915_v44 }
  0x4c   :  { %2000 = vmatprep.subr.bf16.mxu1 %v2454_v49 }
  0x4e   :  { %1978 = vmatpush3.bf16.msra.mxu0 %v1977_v60  ;;  %v2932_v60 = vld [vmem:[%s3308_s1 + $0x160] sm:$0xff] }
  0x4f   :  { %2002 = vmatpush3.bf16.msra.mxu1 %v2478_v4  ;;  %1980 = vmatprep.subr.bf16.mxu0 %v1979_v5  ;;  %v2937_v5 = vld [vmem:[%s3308_s1 + $0x168] sm:$0xff] }
  0x50   :  { %2004 = vmatprep.subr.bf16.mxu1 %v2496_v48 }
  0x52   :  { %1982 = vmatpush3.bf16.msra.mxu0 %v1981_v30 }
  0x53   :  { %2006 = vmatpush3.bf16.msra.mxu1 %v3388_v18  ;;  %2016 = vmatprep.subr.bf16.mxu0 %v2015_v6  ;;  %v3395_v6 = vand.u32 4294901760, %v2513_v56 }
  0x54   :  { %2008 = vmatprep.subr.bf16.mxu1 %v3389_v11 }
  0x55   :  { %554 = vmatmul.mubr.f32.vlgmr.msra.gmra.mrb[2].mxu0 %v2631_v19  ;;  %v3397_v19 = vand.u32 4294901760, %v2536_v61  ;;  %v3403_v61 = vand.u32 4294901760, %v2594_v34 }
  0x56   :  { %2018 = vmatpush3.bf16.msra.mxu0 %v2017_v52  ;;  %828 = vmatprep.mubr.f32.mxu0 %v3390_v8  ;;  %v3400_v52 = vand.u32 4294901760, %v2564_v54  ;;  %v3404_v54 = vand.u32 4294901760, %v2603_v41  ;;  %v2824_v41 = vld [vmem:[%s3308_s1 + $0x118] sm:$0xff] }
  0x57   :  { %2010 = vmatpush3.bf16.msra.mxu1 %v3391_v13  ;;  %2020 = vmatprep.subr.bf16.mxu0 %v2019_v33  ;;  %v3394_v33 = vand.u32 4294901760, %v2498_v51  ;;  %v3399_v51 = vand.u32 4294901760, %v2555_v29 }
  0x58   :  { %2012 = vmatprep.subr.bf16.mxu1 %v3392_v1 }
  0x5a   :  { %2022 = vmatpush3.bf16.msra.mxu0 %v2021_v47  ;;  %v3401_v47 = vand.u32 4294901760, %v2578_v53  ;;  %v2803_v53 = vld [vmem:[%s3308_s1 + $0x108] sm:$0xff] }
  0x5b   :  { %2014 = vmatpush3.bf16.msra.mxu1 %v3393_v36  ;;  %2024 = vmatprep.subr.bf16.mxu0 %v2023_v55  ;;  %v943_v34 = vand.u32 4294901760, %v2803_v53  ;;  %v949_v55 = vand.u32 4294901760, %v2824_v41 }
  0x5c   :  { %2048 = vmatprep.subr.bf16.mxu1 %v2328_v14  ;;  %v2035_v14 = vpack.c.bf16 %v3395_v6, %v3394_v33  ;;  %v2976_v6 = vld [vmem:[%s3308_s1 + $0x180] sm:$0xff] }
  0x5e   :  { %662 = vmatmul.mubr.f32.vlgmr.msra.gmra.mrb[2].mxu1 %v181_v35  ;;  %2026 = vmatpush3.bf16.msra.mxu0 %v2025_v9  ;;  %v2846_v9 = vld [vmem:[%s3308_s1 + $0x128] sm:$0xff] }
  0x5f   :  { %2050 = vmatpush3.bf16.msra.mxu1 %v2338_v20  ;;  %2028 = vmatprep.subr.bf16.mxu0 %v2027_v59  ;;  %v14_v20 = vld [vmem:[%s3309_s0 + $0x18] sm:$0xff]  ;;  %v955_v59 = vand.u32 4294901760, %v2846_v9 }
  0x60   :  { %2052 = vmatprep.subr.bf16.mxu1 %v2342_v22  ;;  %932 = vmatprep.mubr.f32.mxu1 %v3390_v8  ;;  %v3396_v22 = vand.u32 4294901760, %v2522_v0  ;;  %v2041_v0 = vpack.c.bf16 %v3401_v47, %v3400_v52  ;;  %v2954_v8 = vld [vmem:[%s3308_s1 + $0x170] sm:$0xff] }
  0x61   :  { %v13_v47 = vld [vmem:[%s3309_s0 + $0x10] sm:$0xff] }
  0x62   :  { %2030 = vmatpush3.bf16.msra.mxu0 %v2029_v40  ;;  %v2037_v35 = vpack.c.bf16 %v3397_v19, %v3396_v22  ;;  %v988_v22 = vand.u32 4294901760, %v2976_v6 }
  0x63   :  { %2054 = vmatpush3.bf16.msra.mxu1 %v2355_v27  ;;  %2032 = vmatprep.subr.bf16.mxu0 %v2031_v46  ;;  %v3398_v27 = vand.u32 4294901760, %v2540_v7  ;;  %v961_v46 = vand.u32 4294901760, %v2869_v38 }
  0x64   :  { %2056 = vmatprep.subr.bf16.mxu1 %v2372_v39  ;;  %v71_v39 = vsel %vm69_vm0, %v14_v20, 0 }
  0x65   :  { %v2039_v56 = vpack.c.bf16 %v3399_v51, %v3398_v27  ;;  %v2788_v31 = vand.u32 4294901760, %v71_v39  ;;  %v2901_v12 = vpack.c.bf16 %v961_v46, %v958_v24  ;;  %v3003_v27 = vld [vmem:[%s3308_s1 + $0x198] sm:$0xff]  ;;  %v68_v51 = vld [vmem:[%s3308_s1 + $0x1a8] sm:$0x1] }
  0x66   :  { %2034 = vmatpush3.bf16.msra.mxu0 %v2033_v63  ;;  %v3358_v52 = vand.u32 4294901760, %v3003_v27 }
  0x67   :  { %2058 = vmatpush3.bf16.msra.mxu1 %v2383_v45  ;;  %2036 = vmatprep.subr.bf16.mxu0 %v2035_v14  ;;  %v3402_v45 = vand.u32 4294901760, %v2582_v37  ;;  %v2813_v32 = vsub.f32 %v71_v39, %v2788_v31  ;;  %v2981_v14 = vld [vmem:[%s3308_s1 + $0x188] sm:$0xff] }
  0x68   :  { %2060 = vmatprep.subr.bf16.mxu1 %v2411_v62  ;;  %v2798_v62 = vld [vmem:[%s3308_s1 + $0x100] sm:$0xff]  ;;  %v3360_v19 = vand.u32 4294901760, %v2981_v14 }
  0x69   :  { %v2043_v7 = vpack.c.bf16 %v3403_v61, %v3402_v45  ;;  %v940_v37 = vand.u32 4294901760, %v2798_v62  ;;  %v1027_v15 = vand.u32 4294901760, %v2813_v32  ;;  %v3028_v45 = vsel %vm73_vm1, %v68_v51, 0 }
  0x6a   :  { %2038 = vmatpush3.bf16.msra.mxu0 %v2037_v35  ;;  %v2998_v35 = vld [vmem:[%s3308_s1 + $0x190] sm:$0xff] }
  0x6b   :  { %2062 = vmatpush3.bf16.msra.mxu1 %v2436_v16  ;;  %2040 = vmatprep.subr.bf16.mxu0 %v2039_v56  ;;  %v3405_v16 = vand.u32 4294901760, %v2635_v2  ;;  %v2831_v2 = vpack.c.bf16 %v943_v34, %v940_v37  ;;  %v1028_v40 = vsub.f32 %v2813_v32, %v1027_v15  ;;  %v3014_v56 = vpack.c.bf16 %v3360_v19, %v988_v22 }
  0x6c   :  { %2064 = vmatprep.subr.bf16.mxu1 %v2454_v49  ;;  %v2819_v49 = vld [vmem:[%s3308_s1 + $0x110] sm:$0xff]  ;;  %v3359_v39 = vand.u32 4294901760, %v2998_v35  ;;  %v3034_v61 = vsub.f32 %v2798_v62, %v940_v37  ;;  %v3356_v62 = vand.u32 4294901760, %v3028_v45 }
  0x6d   :  { %v2045_v29 = vpack.c.bf16 %v3405_v16, %v3404_v54  ;;  %v1029_v63 = vand.u32 4294901760, %v1028_v40  ;;  %v3041_v54 = vsub.f32 %v2803_v53, %v943_v34  ;;  %v3066_v34 = vsub.f32 %v2824_v41, %v949_v55 }
  0x6e   :  { %2042 = vmatpush3.bf16.msra.mxu0 %v2041_v0  ;;  %v3026_v0 = vld [vmem:[%s3308_s1 + $0x1a0] sm:$0xff]  ;;  %v3048_v16 = vpack.c.bf16 %v3358_v52, %v3359_v39  ;;  %v1044_v40 = vand.u32 4294901760, %v3034_v61 }
  0x6f   :  { %2066 = vmatpush3.bf16.msra.mxu1 %v2478_v4  ;;  %2044 = vmatprep.subr.bf16.mxu0 %v2043_v7  ;;  %v946_v4 = vand.u32 4294901760, %v2819_v49  ;;  %v3036_v7 = vand.u32 4294901760, %v13_v47 }
  0x70   :  { %2068 = vmatprep.subr.bf16.mxu1 %v2496_v48  ;;  %v2841_v48 = vld [vmem:[%s3308_s1 + $0x120] sm:$0xff] }
  0x71   :  { %v2855_v25 = vpack.c.bf16 %v949_v55, %v946_v4  ;;  %v952_v26 = vand.u32 4294901760, %v2841_v48  ;;  %v3058_v53 = vsub.f32 %v2819_v49, %v946_v4  ;;  %v3061_v37 = vsub.f32 %v13_v47, %v3036_v7 }
  0x72   :  { %2046 = vmatpush3.bf16.msra.mxu0 %v2045_v29  ;;  %v3357_v29 = vand.u32 4294901760, %v3026_v0  ;;  %v1051_v49 = vand.u32 4294901760, %v3041_v54  ;;  %v3088_v4 = vsub.f32 %v2846_v9, %v955_v59  ;;  %v1065_v47 = vand.u32 4294901760, %v3066_v34 }
  0x73   :  { %2070 = vmatpush3.bf16.msra.mxu1 %v3388_v18  ;;  %2178 = vmatprep.subr.bf16.mxu0 %v2288_v21  ;;  %v2878_v43 = vpack.c.bf16 %v955_v59, %v952_v26  ;;  %v976_v18 = vand.u32 4294901760, %v2932_v60  ;;  %v3083_v41 = vsub.f32 %v2841_v48, %v952_v26  ;;  %v1033_v55 = vand.u32 4294901760, %v3061_v37 }
  0x74   :  { %2072 = vmatprep.subr.bf16.mxu1 %v3389_v11  ;;  %v979_v11 = vand.u32 4294901760, %v2937_v5  ;;  %v1058_v51 = vand.u32 4294901760, %v3058_v53  ;;  %v1045_v48 = vsub.f32 %v3034_v61, %v1044_v40  ;;  %v1052_v26 = vsub.f32 %v3041_v54, %v1051_v49 }
  0x75   :  { %830 = vmatmul.mubr.f32.vlgmr.msra.gmra.mrb[4].mxu0 %v2618_v57  ;;  %v3101_v9 = vsub.f32 %v2864_v28, %v958_v24  ;;  %v3107_v59 = vsub.f32 %v2869_v38, %v961_v46  ;;  %v1034_v52 = vsub.f32 %v3061_v37, %v1033_v55  ;;  %v1066_v28 = vsub.f32 %v3066_v34, %v1065_v47 }
  0x76   :  { %2180 = vmatpush1.bf16.msra.mxu0 %v2831_v2  ;;  %1430 = vmatprep.mubr.f32.mxu0 %v1027_v15  ;;  %v3073_v15 = vpack.c.bf16 %v3356_v62, %v3357_v29  ;;  %v1072_v62 = vand.u32 4294901760, %v3083_v41  ;;  %v1079_v29 = vand.u32 4294901760, %v3088_v4  ;;  %v1046_v38 = vand.u32 4294901760, %v1045_v48 }
  0x77   :  { %2074 = vmatpush3.bf16.msra.mxu1 %v3391_v13  ;;  %2181 = vmatprep.subr.bf16.mxu0 %v2288_v21  ;;  %v2959_v13 = vld [vmem:[%s3308_s1 + $0x178] sm:$0xff]  ;;  %v1053_v24 = vand.u32 4294901760, %v1052_v26  ;;  %v3121_v46 = vsub.f32 %v2887_v58, %v964_v10  ;;  %v1067_v39 = vand.u32 4294901760, %v1066_v28  ;;  %v1086_v48 = vand.u32 4294901760, %v3101_v9 }
  0x78   :  { %2076 = vmatprep.subr.bf16.mxu1 %v3392_v1  ;;  %v2967_v1 = vpack.c.bf16 %v979_v11, %v976_v18  ;;  %v985_v33 = vand.u32 4294901760, %v2959_v13  ;;  %v1093_v26 = vand.u32 4294901760, %v3107_v59  ;;  %v1073_v10 = vsub.f32 %v3083_v41, %v1072_v62 }
  0x79   :  { %v2113_v58 = vpack.c.bf16 %v1053_v24, %v1046_v38  ;;  %v1080_v19 = vsub.f32 %v3088_v4, %v1079_v29 }
  0x7a   :  { %2183 = vmatpush1.bf16.msra.mxu0 %v2855_v25 }
  0x7b   :  { %2078 = vmatpush3.bf16.msra.mxu1 %v3393_v36  ;;  %2184 = vmatprep.subr.bf16.mxu0 %v2288_v21  ;;  %v982_v36 = vand.u32 4294901760, %v2954_v8  ;;  %v1081_v28 = vand.u32 4294901760, %v1080_v19 }
  0x7c   :  { %2079 = vmatprep.subr.bf16.mxu1 %v2288_v21 }
  0x7d   :  { %v2989_v20 = vpack.c.bf16 %v985_v33, %v982_v36 }
  0x7e   :  { %934 = vmatmul.mubr.f32.vlgmr.msra.gmra.mrb[4].mxu1 %v2618_v57  ;;  %2186 = vmatpush1.bf16.msra.mxu0 %v2878_v43  ;;  %v2910_v57 = vld [vmem:[%s3308_s1 + $0x150] sm:$0xff] }
  0x7f   :  { %2081 = vmatpush1.bf16.msra.mxu1 %v2831_v2  ;;  %2187 = vmatprep.subr.bf16.mxu0 %v2288_v21  ;;  %v970_v42 = vand.u32 4294901760, %v2910_v57 }
  0x80   :  { %2082 = vmatprep.subr.bf16.mxu1 %v2288_v21  ;;  %1030 = vmatprep.mubr.f32.mxu1 %v1029_v63  ;;  %v2212_v63 = vpack.c.bf16 %v1051_v49, %v1044_v40  ;;  %v1059_v40 = vsub.f32 %v3058_v53, %v1058_v51  ;;  %v2215_v49 = vpack.c.bf16 %v1065_v47, %v1058_v51  ;;  %v1035_v47 = vand.u32 4294901760, %v1034_v52 }
  0x81   :  { %v2945_v30 = vpack.c.bf16 %v973_v50, %v970_v42 }
  0x82   :  { %2189 = vmatpush1.bf16.msra.mxu0 %v2901_v12  ;;  %v1060_v51 = vand.u32 4294901760, %v1059_v40  ;;  %v2221_v40 = vpack.c.bf16 %v1093_v26, %v1086_v48 }
  0x83   :  { %2084 = vmatpush1.bf16.msra.mxu1 %v2855_v25  ;;  %2190 = vmatprep.subr.bf16.mxu0 %v2288_v21 }
  0x84   :  { %2085 = vmatprep.subr.bf16.mxu1 %v2288_v21  ;;  %v2116_v52 = vpack.c.bf16 %v1067_v39, %v1060_v51 }
  0x86   :  { %2192 = vmatpush1.bf16.msra.mxu0 %v2923_v17 }
  0x87   :  { %2087 = vmatpush1.bf16.msra.mxu1 %v2878_v43  ;;  %2193 = vmatprep.subr.bf16.mxu0 %v2288_v21 }
  0x88   :  { %2088 = vmatprep.subr.bf16.mxu1 %v2288_v21 }
  0x8a   :  { %2195 = vmatpush1.bf16.msra.mxu0 %v2945_v30 }
  0x8b   :  { %2090 = vmatpush1.bf16.msra.mxu1 %v2901_v12  ;;  %2196 = vmatprep.subr.bf16.mxu0 %v2288_v21 }
  0x8c   :  { %2091 = vmatprep.subr.bf16.mxu1 %v2288_v21 }
  0x8e   :  { %2198 = vmatpush1.bf16.msra.mxu0 %v2967_v1 }
  0x8f   :  { %2093 = vmatpush1.bf16.msra.mxu1 %v2923_v17  ;;  %2199 = vmatprep.subr.bf16.mxu0 %v2288_v21 }
  0x90   :  { %2094 = vmatprep.subr.bf16.mxu1 %v2288_v21 }
  0x92   :  { %2201 = vmatpush1.bf16.msra.mxu0 %v2989_v20 }
  0x93   :  { %2096 = vmatpush1.bf16.msra.mxu1 %v2945_v30  ;;  %2202 = vmatprep.subr.bf16.mxu0 %v2288_v21 }
  0x94   :  { %2097 = vmatprep.subr.bf16.mxu1 %v2288_v21 }
  0x96   :  { %2204 = vmatpush1.bf16.msra.mxu0 %v3014_v56 }
  0x97   :  { %2099 = vmatpush1.bf16.msra.mxu1 %v2967_v1  ;;  %2205 = vmatprep.subr.bf16.mxu0 %v2288_v21 }
  0x98   :  { %2100 = vmatprep.subr.bf16.mxu1 %v2288_v21 }
  0x9a   :  { %2207 = vmatpush1.bf16.msra.mxu0 %v3048_v16 }
  0x9b   :  { %2102 = vmatpush1.bf16.msra.mxu1 %v2989_v20  ;;  %2208 = vmatprep.subr.bf16.mxu0 %v2288_v21 }
  0x9c   :  { %2103 = vmatprep.subr.bf16.mxu1 %v2288_v21 }
  0x9e   :  { %2210 = vmatpush1.bf16.msra.mxu0 %v3073_v15 }
  0x9f   :  { %2105 = vmatpush1.bf16.msra.mxu1 %v3014_v56  ;;  %2211 = vmatprep.subr.bf16.mxu0 %v2288_v21 }
  0xa0   :  { %2106 = vmatprep.subr.bf16.mxu1 %v2288_v21 }
  0xa1   :  { %1434 = vmatmul.mubr.f32.vlgmr.msra.gmra.mrb[6].mxu0 %v1033_v55  ;;  %v3126_v55 = vsub.f32 %v2892_v3, %v967_v23  ;;  %v3138_v3 = vsub.f32 %v2910_v57, %v970_v42  ;;  %v3143_v23 = vsub.f32 %v2915_v44, %v973_v50  ;;  %v1087_v57 = vsub.f32 %v3101_v9, %v1086_v48 }
  0xa2   :  { %2213 = vmatpush1.bf16.msra.mxu0 %v2212_v63  ;;  %1570 = vmatprep.mubr.f32.mxu0 %v2788_v31  ;;  %v2218_v63 = vpack.c.bf16 %v1079_v29, %v1072_v62  ;;  %v1100_v62 = vand.u32 4294901760, %v3121_v46  ;;  %v1094_v42 = vsub.f32 %v3107_v59, %v1093_v26  ;;  %v3155_v44 = vsub.f32 %v2932_v60, %v976_v18 }
  0xa3   :  { %2108 = vmatpush1.bf16.msra.mxu1 %v3048_v16  ;;  %2214 = vmatprep.subr.bf16.mxu0 %v2288_v21  ;;  %v1107_v29 = vand.u32 4294901760, %v3126_v55  ;;  %v3160_v50 = vsub.f32 %v2937_v5, %v979_v11  ;;  %v1114_v39 = vand.u32 4294901760, %v3138_v3  ;;  %v1121_v38 = vand.u32 4294901760, %v3143_v23 }
  0xa4   :  { %2109 = vmatprep.subr.bf16.mxu1 %v2288_v21  ;;  %v1101_v24 = vsub.f32 %v3121_v46, %v1100_v62  ;;  %v1088_v51 = vand.u32 4294901760, %v1087_v57  ;;  %v1095_v60 = vand.u32 4294901760, %v1094_v42  ;;  %v3171_v5 = vsub.f32 %v2954_v8, %v982_v36 }
  0xa5   :  { %v2224_v19 = vpack.c.bf16 %v1107_v29, %v1100_v62  ;;  %v1108_v18 = vsub.f32 %v3126_v55, %v1107_v29  ;;  %v3176_v11 = vsub.f32 %v2959_v13, %v985_v33  ;;  %v1128_v26 = vand.u32 4294901760, %v3155_v44 }
  0xa6   :  { %2216 = vmatpush1.bf16.msra.mxu0 %v2215_v49  ;;  %v1074_v49 = vand.u32 4294901760, %v1073_v10  ;;  %v1102_v48 = vand.u32 4294901760, %v1101_v24  ;;  %v2122_v10 = vpack.c.bf16 %v1095_v60, %v1088_v51  ;;  %v1115_v8 = vsub.f32 %v3138_v3, %v1114_v39 }
  0xa7   :  { %2111 = vmatpush1.bf16.msra.mxu1 %v3073_v15  ;;  %2217 = vmatprep.subr.bf16.mxu0 %v2288_v21  ;;  %v1122_v36 = vsub.f32 %v3143_v23, %v1121_v38  ;;  %v3187_v13 = vsub.f32 %v2976_v6, %v988_v22  ;;  %v3406_v33 = vand.u32 4294901760, %v2981_v14  ;;  %v1142_v29 = vand.u32 4294901760, %v3171_v5 }
  0xa8   :  { %2112 = vmatprep.subr.bf16.mxu1 %v2288_v21  ;;  %v1116_v42 = vand.u32 4294901760, %v1115_v8 }
  0xa9   :  { %v1123_v6 = vand.u32 4294901760, %v1122_v36  ;;  %v1156_v51 = vand.u32 4294901760, %v3187_v13 }
  0xaa   :  { %1036 = vmatmul.mubr.f32.vlgmr.msra.gmra.mrb[6].mxu1 %v1035_v47  ;;  %2219 = vmatpush1.bf16.msra.mxu0 %v2218_v63  ;;  %v2119_v63 = vpack.c.bf16 %v1081_v28, %v1074_v49  ;;  %v2227_v47 = vpack.c.bf16 %v1121_v38, %v1114_v39  ;;  %v1149_v49 = vand.u32 4294901760, %v3176_v11  ;;  %v1129_v28 = vsub.f32 %v3155_v44, %v1128_v26 }
  0xab   :  { %2114 = vmatpush1.bf16.msra.mxu1 %v2113_v58  ;;  %2220 = vmatprep.subr.bf16.mxu0 %v2288_v21  ;;  %v1135_v58 = vand.u32 4294901760, %v3160_v50  ;;  %v3408_v39 = vand.u32 4294901760, %v3003_v27 }
  0xac   :  { %2115 = vmatprep.subr.bf16.mxu1 %v2288_v21  ;;  %1216 = vmatprep.mubr.f32.mxu1 %v2788_v31  ;;  %v2233_v24 = vpack.c.bf16 %v1149_v49, %v1142_v29 }
  0xad   :  { %v2230_v62 = vpack.c.bf16 %v1135_v58, %v1128_v26  ;;  %v1136_v22 = vsub.f32 %v3160_v50, %v1135_v58  ;;  %v3208_v38 = vsub.f32 %v3003_v27, %v3408_v39  ;;  %v3409_v27 = vand.u32 4294901760, %v3026_v0 }
  0xae   :  { %2222 = vmatpush1.bf16.msra.mxu0 %v2221_v40  ;;  %v3192_v40 = vsub.f32 %v2981_v14, %v3406_v33  ;;  %v3407_v14 = vand.u32 4294901760, %v2998_v35  ;;  %v3410_v58 = vand.u32 4294901760, %v3028_v45  ;;  %v1157_v33 = vsub.f32 %v3187_v13, %v1156_v51 }
  0xaf   :  { %2117 = vmatpush1.bf16.msra.mxu1 %v2116_v52  ;;  %2223 = vmatprep.subr.bf16.mxu0 %v2288_v21  ;;  %v1109_v52 = vand.u32 4294901760, %v1108_v18  ;;  %v2128_v18 = vpack.c.bf16 %v1123_v6, %v1116_v42  ;;  %v3219_v26 = vsub.f32 %v3026_v0, %v3409_v27  ;;  %v1177_v36 = vand.u32 4294901760, %v3208_v38 }
  0xb0   :  { %2118 = vmatprep.subr.bf16.mxu1 %v2288_v21  ;;  %v1163_v60 = vand.u32 4294901760, %v3192_v40 }
  0xb1   :  { %v2125_v57 = vpack.c.bf16 %v1109_v52, %v1102_v48  ;;  %v1150_v48 = vsub.f32 %v3176_v11, %v1149_v49  ;;  %v1178_v39 = vsub.f32 %v3208_v38, %v1177_v36 }
  0xb2   :  { %2225 = vmatpush1.bf16.msra.mxu0 %v2224_v19  ;;  %v3203_v19 = vsub.f32 %v2998_v35, %v3407_v14  ;;  %v1143_v35 = vsub.f32 %v3171_v5, %v1142_v29  ;;  %v2236_v52 = vpack.c.bf16 %v1163_v60, %v1156_v51  ;;  %v1164_v49 = vsub.f32 %v3192_v40, %v1163_v60 }
  0xb3   :  { %2120 = vmatpush1.bf16.msra.mxu1 %v2119_v63  ;;  %2226 = vmatprep.subr.bf16.mxu0 %v2288_v21  ;;  %v1130_v63 = vand.u32 4294901760, %v1129_v28  ;;  %v1151_v0 = vand.u32 4294901760, %v1150_v48  ;;  %v1158_v28 = vand.u32 4294901760, %v1157_v33 }
  0xb4   :  { %2121 = vmatprep.subr.bf16.mxu1 %v2288_v21  ;;  %v1170_v8 = vand.u32 4294901760, %v3203_v19  ;;  %v1144_v29 = vand.u32 4294901760, %v1143_v35 }
  0xb6   :  { %2228 = vmatpush1.bf16.msra.mxu0 %v2227_v47  ;;  %v1137_v47 = vand.u32 4294901760, %v1136_v22  ;;  %v2134_v6 = vpack.c.bf16 %v1151_v0, %v1144_v29  ;;  %v1165_v22 = vand.u32 4294901760, %v1164_v49  ;;  %v1171_v14 = vsub.f32 %v3203_v19, %v1170_v8 }
  0xb7   :  { %2123 = vmatpush1.bf16.msra.mxu1 %v2122_v10  ;;  %2229 = vmatprep.subr.bf16.mxu0 %v2288_v21  ;;  %v3224_v10 = vsub.f32 %v3028_v45, %v3410_v58  ;;  %v2239_v45 = vpack.c.bf16 %v1177_v36, %v1170_v8 }
  0xb8   :  { %2124 = vmatprep.subr.bf16.mxu1 %v2288_v21  ;;  %v2137_v51 = vpack.c.bf16 %v1165_v22, %v1158_v28  ;;  %v1172_v60 = vand.u32 4294901760, %v1171_v14 }
  0xb9   :  { %v1191_v42 = vand.u32 4294901760, %v3224_v10 }
  0xba   :  { %2231 = vmatpush1.bf16.msra.mxu0 %v2230_v62  ;;  %v2131_v62 = vpack.c.bf16 %v1137_v47, %v1130_v63 }
  0xbb   :  { %2126 = vmatpush1.bf16.msra.mxu1 %v2125_v57  ;;  %2232 = vmatprep.subr.bf16.mxu0 %v2288_v21  ;;  %v1184_v57 = vand.u32 4294901760, %v3219_v26  ;;  %v1192_v47 = vsub.f32 %v3224_v10, %v1191_v42 }
  0xbc   :  { %2127 = vmatprep.subr.bf16.mxu1 %v2288_v21 }
  0xbd   :  { %v1185_v63 = vsub.f32 %v3219_v26, %v1184_v57  ;;  %v1193_v27 = vand.u32 4294901760, %v1192_v47 }
  0xbe   :  { %2234 = vmatpush1.bf16.msra.mxu0 %v2233_v24  ;;  %v2242_v24 = vpack.c.bf16 %v1191_v42, %v1184_v57 }
  0xbf   :  { %2129 = vmatpush1.bf16.msra.mxu1 %v2128_v18  ;;  %2235 = vmatprep.subr.bf16.mxu0 %v2288_v21  ;;  %v1179_v18 = vand.u32 4294901760, %v1178_v39  ;;  %v1186_v48 = vand.u32 4294901760, %v1185_v63 }
  0xc0   :  { %2130 = vmatprep.subr.bf16.mxu1 %v2288_v21 }
  0xc1   :  { %v2140_v35 = vpack.c.bf16 %v1179_v18, %v1172_v60  ;;  %v2143_v58 = vpack.c.bf16 %v1193_v27, %v1186_v48 }
  0xc2   :  { %2237 = vmatpush1.bf16.msra.mxu0 %v2236_v52  ;;  %v2146_v52 = vpack.c.bf16 %v3041_v54, %v3034_v61 }
  0xc3   :  { %2132 = vmatpush1.bf16.msra.mxu1 %v2131_v62  ;;  %2238 = vmatprep.subr.bf16.mxu0 %v2288_v21 }
  0xc4   :  { %2133 = vmatprep.subr.bf16.mxu1 %v2288_v21 }
  0xc6   :  { %2240 = vmatpush1.bf16.msra.mxu0 %v2239_v45 }
  0xc7   :  { %2135 = vmatpush1.bf16.msra.mxu1 %v2134_v6  ;;  %2241 = vmatprep.subr.bf16.mxu0 %v2288_v21 }
  0xc8   :  { %2136 = vmatprep.subr.bf16.mxu1 %v2288_v21 }
  0xca   :  { %2243 = vmatpush1.bf16.msra.mxu0 %v2242_v24 }
  0xcb   :  { %2138 = vmatpush1.bf16.msra.mxu1 %v2137_v51  ;;  %2244 = vmatprep.subr.bf16.mxu0 %v2288_v21 }
  0xcc   :  { %2139 = vmatprep.subr.bf16.mxu1 %v2288_v21 }
  0xcd   :  { %1572 = vmatmul.mubr.f32.vlgmr.msra.gmra.mrb[6].mxu0 %v3036_v7 }
  0xce   :  { %2246 = vmatpush1.bf16.msra.mxu0 %v2831_v2  ;;  %1664 = vmatprep.mubr.f32.mxu0 %v2788_v31  ;;  %v2149_v31 = vpack.c.bf16 %v3066_v34, %v3058_v53  ;;  %v2152_v2 = vpack.c.bf16 %v3088_v4, %v3083_v41 }
  0xcf   :  { %2141 = vmatpush1.bf16.msra.mxu1 %v2140_v35  ;;  %2247 = vmatprep.subr.bf16.mxu0 %v2288_v21 }
  0xd0   :  { %2142 = vmatprep.subr.bf16.mxu1 %v2288_v21 }
  0xd2   :  { %2249 = vmatpush1.bf16.msra.mxu0 %v2855_v25  ;;  %v2155_v25 = vpack.c.bf16 %v3107_v59, %v3101_v9 }
  0xd3   :  { %2144 = vmatpush1.bf16.msra.mxu1 %v2143_v58  ;;  %2250 = vmatprep.subr.bf16.mxu0 %v2288_v21 }
  0xd4   :  { %2145 = vmatprep.subr.bf16.mxu1 %v2288_v21 }
  0xd6   :  { %1218 = vmatmul.mubr.f32.vlgmr.msra.gmra.mrb[6].mxu1 %v3036_v7  ;;  %2252 = vmatpush1.bf16.msra.mxu0 %v2878_v43  ;;  %v2161_v43 = vpack.c.bf16 %v3143_v23, %v3138_v3 }
  0xd7   :  { %2147 = vmatpush1.bf16.msra.mxu1 %v2146_v52  ;;  %2253 = vmatprep.subr.bf16.mxu0 %v2288_v21 }
  0xd8   :  { %2148 = vmatprep.subr.bf16.mxu1 %v2288_v21  ;;  %1333 = vmatprep.mubr.f32.mxu1 %v2813_v32  ;;  %v2158_v32 = vpack.c.bf16 %v3126_v55, %v3121_v46 }
  0xda   :  { %2255 = vmatpush1.bf16.msra.mxu0 %v2901_v12  ;;  %v2164_v12 = vpack.c.bf16 %v3160_v50, %v3155_v44 }
  0xdb   :  { %2150 = vmatpush1.bf16.msra.mxu1 %v2149_v31  ;;  %2256 = vmatprep.subr.bf16.mxu0 %v2288_v21 }
  0xdc   :  { %2151 = vmatprep.subr.bf16.mxu1 %v2288_v21 }
  0xde   :  { %2258 = vmatpush1.bf16.msra.mxu0 %v2923_v17  ;;  %v2167_v17 = vpack.c.bf16 %v3176_v11, %v3171_v5 }
  0xdf   :  { %2153 = vmatpush1.bf16.msra.mxu1 %v2152_v2  ;;  %2259 = vmatprep.subr.bf16.mxu0 %v2288_v21 }
  0xe0   :  { %2154 = vmatprep.subr.bf16.mxu1 %v2288_v21 }
  0xe2   :  { %2261 = vmatpush1.bf16.msra.mxu0 %v2945_v30  ;;  %v2170_v30 = vpack.c.bf16 %v3192_v40, %v3187_v13 }
  0xe3   :  { %2156 = vmatpush1.bf16.msra.mxu1 %v2155_v25  ;;  %2262 = vmatprep.subr.bf16.mxu0 %v2288_v21 }
  0xe4   :  { %2157 = vmatprep.subr.bf16.mxu1 %v2288_v21 }
  0xe6   :  { %2264 = vmatpush1.bf16.msra.mxu0 %v2967_v1  ;;  %v2173_v1 = vpack.c.bf16 %v3208_v38, %v3203_v19 }
  0xe7   :  { %2159 = vmatpush1.bf16.msra.mxu1 %v2158_v32  ;;  %2265 = vmatprep.subr.bf16.mxu0 %v2288_v21 }
  0xe8   :  { %2160 = vmatprep.subr.bf16.mxu1 %v2288_v21 }
  0xea   :  { %2267 = vmatpush1.bf16.msra.mxu0 %v2989_v20  ;;  %v2176_v20 = vpack.c.bf16 %v3224_v10, %v3219_v26 }
  0xeb   :  { %2162 = vmatpush1.bf16.msra.mxu1 %v2161_v43  ;;  %2268 = vmatprep.subr.bf16.mxu0 %v2288_v21 }
  0xec   :  { %2163 = vmatprep.subr.bf16.mxu1 %v2288_v21 }
  0xee   :  { %2270 = vmatpush1.bf16.msra.mxu0 %v3014_v56 }
  0xef   :  { %2165 = vmatpush1.bf16.msra.mxu1 %v2164_v12  ;;  %2271 = vmatprep.subr.bf16.mxu0 %v2288_v21 }
  0xf0   :  { %2166 = vmatprep.subr.bf16.mxu1 %v2288_v21 }
  0xf2   :  { %2273 = vmatpush1.bf16.msra.mxu0 %v3048_v16 }
  0xf3   :  { %2168 = vmatpush1.bf16.msra.mxu1 %v2167_v17  ;;  %2274 = vmatprep.subr.bf16.mxu0 %v2288_v21 }
  0xf4   :  { %2169 = vmatprep.subr.bf16.mxu1 %v2288_v21 }
  0xf6   :  { %2276 = vmatpush1.bf16.msra.mxu0 %v3073_v15 }
  0xf7   :  { %2171 = vmatpush1.bf16.msra.mxu1 %v2170_v30 }
  0xf8   :  { %2172 = vmatprep.subr.bf16.mxu1 %v2288_v21 }
  0xf9   :  { %1666 = vmatmul.mubr.f32.vlgmr.msra.gmra.mrb[6].mxu0 %v3036_v7 }
  0xfb   :  { %2174 = vmatpush1.bf16.msra.mxu1 %v2173_v1 }
  0xfc   :  { %2175 = vmatprep.subr.bf16.mxu1 %v2288_v21 }
  0xff   :  { %2177 = vmatpush1.bf16.msra.mxu1 %v2176_v20 }
 0x102   :  { %1336 = vmatmul.mubr.f32.vlgmr.msra.gmra.mrb[6].mxu1 %v3061_v37 }
 0x108   :  { %v1709_v56 = vpop.f32.mrb[0].mxu0 }
 0x109   :  { %v1710_v61 = vpop.f32.mrb[1].mxu0 }
 0x10a   :  { %v1711_v54 = vadd.f32 %v1710_v61, %v1709_v56 }
 0x111   :  { %v1744_v16 = vpop.f32.mrb[0].mxu1 }
 0x112   :  { %v1745_v53 = vpop.f32.mrb[1].mxu1 }
 0x113   :  { %v1746_v34 = vadd.f32 %v1745_v53, %v1744_v16 }
 0x115   :  { %v418_v15 = vadd.f32 %v1746_v34, %v1711_v54 }
 0x128   :  { %v1779_v41 = vpop.f32.mrb[2].mxu0 }
 0x129   :  { %v1780_v4 = vpop.f32.mrb[3].mxu0 }
 0x12a   :  { %v1781_v9 = vadd.f32 %v1780_v4, %v1779_v41 }
 0x12c   :  { %v556_v7 = vadd.f32 %v1781_v9, %v418_v15 }
 0x131   :  { %v1814_v59 = vpop.f32.mrb[2].mxu1 }
 0x132   :  { %v1815_v46 = vpop.f32.mrb[3].mxu1 }
 0x133   :  { %v1816_v55 = vadd.f32 %v1815_v46, %v1814_v59 }
 0x135   :  { %v664_v3 = vadd.f32 %v1816_v55, %v556_v7 }
 0x148   :  { %v1849_v23 = vpop.f32.mrb[4].mxu0 }
 0x149   :  { %v1850_v21 = vpop.f32.mrb[5].mxu0 }
 0x14a   :  { %v1851_v44 = vadd.f32 %v1850_v21, %v1849_v23 }
 0x14c   :  { %v832_v50 = vadd.f32 %v1851_v44, %v664_v3 }
 0x151   :  { %v1884_v37 = vpop.f32.mrb[4].mxu1 }
 0x152   :  { %v1885_v5 = vpop.f32.mrb[5].mxu1 }
 0x153   :  { %v1886_v11 = vadd.f32 %v1885_v5, %v1884_v37 }
 0x155   :  { %v936_v13 = vadd.f32 %v1886_v11, %v832_v50 }
 0x1cc   :  { %v1667_v40 = vpop.f32.mrb[6].mxu0 }
 0x1cd   :  { %v1669_v19 = vpop.f32.mrb[7].mxu0 }
 0x1d5   :  { %v1337_v38 = vpop.f32.mrb[6].mxu1 }
 0x1d6   :  { %v2277_v26 = vadd.f32 %v1337_v38, %v936_v13  ;;  %v1339_v10 = vpop.f32.mrb[7].mxu1 }
 0x1d8   :  { %v2278_v8 = vadd.f32 %v2277_v26, %v1667_v40 }
 0x1da   :  { %1672 = vst.msk [vmem:[%s3310_s2] sm:$0xff] %vm1671_vm2, %v2278_v8 }

</bundles_post_ra>
